<compile_context>
chip_gen: v7x
topology: tpu7x:2x2x1
jax: 0.10.0
libtpu: 0.0.40
codegen_flags: <defaults>
</compile_context>

<pallas_src>
import jax
import jax.numpy as jnp
from jax.experimental import pallas as pl
from jax.experimental.pallas import tpu as pltpu


# ----------------------------- hyperparameters ------------------------------
ENCODER_NODES = [16, 32, 32]   # encoderLayers = 3 -> 2 encoder Linear layers
LATENT_NODES = 4
QUESTION_NODES = 2
DECODER_NODES = [32, 32, 16]   # decoderLayers = 3 -> 2 decoder Linear layers
BATCH = 8

# Packed transposed layouts ----------------------------------------------------
IN_ROWS = 32      # input slab rows : x 0:16 | q 16:18 | zeros | gauss 24:28 | zeros
OUT_ROWS = 40     # output slab rows: mu 0:4 | sig 8:12 | z 16:20 | y 24:40
W_ROWS = 6 * 32   # six 32-row weight bands stacked into one slab
MAX_TILE = 2048   # max batch (lane) tile


def _round_up(n, m):
    return ((n + m - 1) // m) * m


def _batch_tiling(B):
    """Pick (B_pad, tb) for the batch/lane axis.

    The kernel is grid-step-overhead bound, so take big tiles. When the batch
    is large enough, use an even grid of >= 2 steps so the "parallel" batch
    axis can be split across v7x's two TensorCores (irrelevant on v5e/v6e).
    """
    if B <= 256:
        b_pad = _round_up(B, 128)
        return b_pad, b_pad                    # single step
    if B <= 2 * MAX_TILE:
        b_pad = _round_up(B, 256)
        return b_pad, b_pad // 2               # exactly 2 (even) steps
    b_pad = _round_up(B, MAX_TILE)
    return b_pad, MAX_TILE


# --------------------------------- kernel -----------------------------------
def scinet_kernel(in_ref, w_ref, b_ref, out_ref):
    ins = in_ref[...]                                    # (32, tb)

    # Push 1 (fused): rows 0:32 = encoder-1 pre-activation,
    # rows 32:64 = decoder-1 question contribution (wd1_q @ q^T + bd1).
    a1 = jnp.dot(w_ref[0:64, :], ins,
                 preferred_element_type=jnp.float32) + b_ref[0:64, :]
    h1 = jnp.maximum(a1[0:32], 0.0)                      # encoder layer 1 + ReLU
    qc = a1[32:64]                                       # pre-activation (ReLU later)

    # Push 2: encoder layer 2 + ReLU
    h2 = jnp.dot(w_ref[64:96, :], h1,
                 preferred_element_type=jnp.float32) + b_ref[64:96, :]
    h2 = jnp.maximum(h2, 0.0)

    # Push 3: latent heads — mu at band rows 0:4, sig at band rows 8:12.
    heads = jnp.dot(w_ref[96:128, :], h2,
                    preferred_element_type=jnp.float32) + b_ref[96:128, :]
    mu8 = heads[0:8]                                     # mu rows 0:4, zeros 4:8
    sig8 = 0.5 * heads[8:16]                             # PyTorch in-place sig.mul_(0.5)
    gauss8 = ins[24:32]                                  # gauss rows 0:4, zeros 4:8
    z8 = mu8 + gauss8 * jnp.exp(sig8)                    # reparameterize; rows 4:8 stay 0

    # Push 4: decoder-1 Z contribution; add question contribution; ReLU.
    z32 = jnp.concatenate(
        [z8, jnp.zeros((24, z8.shape[1]), jnp.float32)], axis=0)
    d = jnp.maximum(
        qc + jnp.dot(w_ref[128:160, :], z32, preferred_element_type=jnp.float32),
        0.0)

    # Push 5: decoder layer 2 (output rows 0:16).
    y = jnp.dot(w_ref[160:192, :], d,
                preferred_element_type=jnp.float32) + b_ref[160:192, :]

    # Lane-dense, 8-row-aligned sublane-band stores (no lane concatenation).
    out_ref[0:8, :] = mu8
    out_ref[8:16, :] = sig8
    out_ref[16:24, :] = z8
    out_ref[24:40, :] = y[0:16]


# -------------------------------- wrapper ------------------------------------
def scinet_forward(x, question, gauss, packed_params):
    """Runs the fused Scinet forward. Returns (mu, sig, Z, Y)."""
    W, Bz = packed_params
    B = x.shape[0]
    b_pad, tb = _batch_tiling(B)

    # Pack x | question | gauss into ONE transposed slab (1 input DMA / step).
    ins = jnp.zeros((IN_ROWS, b_pad), jnp.float32)
    ins = ins.at[0:16, :B].set(x.T)
    ins = ins.at[16:18, :B].set(question.T)
    ins = ins.at[24:28, :B].set(gauss.T)

    out = pl.pallas_call(
        scinet_kernel,
        out_shape=jax.ShapeDtypeStruct((OUT_ROWS, b_pad), jnp.float32),
        grid=(b_pad // tb,),
        in_specs=[
            pl.BlockSpec((IN_ROWS, tb), lambda i: (0, i)),
            # Weights / biases: constant block index -> stay VMEM resident.
            pl.BlockSpec((W_ROWS, 32), lambda i: (0, 0)),
            pl.BlockSpec((W_ROWS, 1), lambda i: (0, 0)),
        ],
        out_specs=pl.BlockSpec((OUT_ROWS, tb), lambda i: (0, i)),
        compiler_params=pltpu.CompilerParams(
            dimension_semantics=("parallel",),   # v7x: shard batch grid on 2 TCs
        ),
    )(ins, W, Bz)

    mu = out[0:4, :B].T
    sig = out[8:12, :B].T
    z = out[16:20, :B].T
    y = out[24:40, :B].T
    return mu, sig, z, y


# ---------------------------- parameter handling ------------------------------
def init_params(key):
    """Deterministic synthetic Linear weights; stored as (in, out) + (1, out)."""
    def linear(k, n_in, n_out):
        k1, k2 = jax.random.split(k)
        w = jax.random.normal(k1, (n_in, n_out), jnp.float32) * 0.1
        b = jax.random.normal(k2, (1, n_out), jnp.float32) * 0.1
        return w, b

    keys = jax.random.split(key, 6)
    we1, be1 = linear(keys[0], ENCODER_NODES[0], ENCODER_NODES[1])
    we2, be2 = linear(keys[1], ENCODER_NODES[1], ENCODER_NODES[2])
    wmu, bmu = linear(keys[2], ENCODER_NODES[-1], LATENT_NODES)
    wsig, bsig = linear(keys[3], ENCODER_NODES[-1], LATENT_NODES)
    # decoder-1: Linear(questionNodes + latentNodes, 32); input is cat((q, Z))
    wd1, bd1 = linear(keys[4], QUESTION_NODES + LATENT_NODES, DECODER_NODES[0])
    wd1q = wd1[:QUESTION_NODES]
    wd1z = wd1[QUESTION_NODES:]
    wd2, bd2 = linear(keys[5], DECODER_NODES[1], DECODER_NODES[2])
    return [we1, be1, we2, be2, wmu, bmu, wsig, bsig, wd1q, wd1z, bd1, wd2, bd2]


def pack_params(params):
    """Pack all transposed weights into one (192, 32) slab + (192, 1) biases."""
    (we1, be1, we2, be2, wmu, bmu, wsig, bsig,
     wd1q, wd1z, bd1, wd2, bd2) = params

    W = jnp.zeros((W_ROWS, 32), jnp.float32)
    # band 0 (rows 0:32):   encoder-1 (x lives at input-slab cols 0:16)
    W = W.at[0:32, 0:16].set(we1.T)
    # band 1 (rows 32:64):  decoder-1 question part (q at input-slab cols 16:18)
    W = W.at[32:64, 16:18].set(wd1q.T)
    # band 2 (rows 64:96):  encoder-2
    W = W.at[64:96, 0:32].set(we2.T)
    # band 3 (rows 96:128): latent heads — mu band rows 0:4, sig band rows 8:12
    W = W.at[96:100, 0:32].set(wmu.T)
    W = W.at[104:108, 0:32].set(wsig.T)
    # band 4 (rows 128:160): decoder-1 Z part (z lives at z-slab cols 0:4)
    W = W.at[128:160, 0:4].set(wd1z.T)
    # band 5 (rows 160:192): decoder-2 (16 output rows)
    W = W.at[160:176, 0:32].set(wd2.T)

    Bz = jnp.zeros((W_ROWS, 1), jnp.float32)
    Bz = Bz.at[0:32, 0].set(be1[0])
    Bz = Bz.at[32:64, 0].set(bd1[0])      # decoder-1 bias rides with the question part
    Bz = Bz.at[64:96, 0].set(be2[0])
    Bz = Bz.at[96:100, 0].set(bmu[0])
    Bz = Bz.at[104:108, 0].set(bsig[0])
    # band 4 bias rows (128:160) intentionally zero: bd1 already folded above.
    Bz = Bz.at[160:176, 0].set(bd2[0])
    return W, Bz


# ------------------------------- reference ------------------------------------
def reference_forward(x, question, gauss, params):
    """Pure-JAX reference matching the PyTorch module semantics."""
    (we1, be1, we2, be2, wmu, bmu, wsig, bsig,
     wd1q, wd1z, bd1, wd2, bd2) = params
    h = jnp.maximum(x @ we1 + be1, 0.0)
    h = jnp.maximum(h @ we2 + be2, 0.0)
    mu = h @ wmu + bmu
    sig = 0.5 * (h @ wsig + bsig)
    z = mu + gauss * jnp.exp(sig)
    zin = jnp.concatenate([question, z], axis=-1)
    wd1 = jnp.concatenate([wd1q, wd1z], axis=0)
    d = jnp.maximum(zin @ wd1 + bd1, 0.0)
    y = d @ wd2 + bd2
    return mu, sig, z, y


# ---------------------------------- main --------------------------------------
if __name__ == "__main__":
    key = jax.random.PRNGKey(0)
    k_data, k_p = jax.random.split(key, 2)

    params = init_params(k_p)
    packed = pack_params(params)

    def check(batch, k):
        kx, kq, kg = jax.random.split(k, 3)
        x = jax.random.normal(kx, (batch, ENCODER_NODES[0]), jnp.float32)
        question = jax.random.normal(kq, (batch, QUESTION_NODES), jnp.float32)
        # torch.randn_like(sig) noise supplied externally (deterministic here)
        gauss = jax.random.normal(kg, (batch, LATENT_NODES), jnp.float32)

        mu, sig, z, y = scinet_forward(x, question, gauss, packed)
        jax.block_until_ready((mu, sig, z, y))

        mu_r, sig_r, z_r, y_r = reference_forward(x, question, gauss, params)
        assert jnp.allclose(mu, mu_r, atol=1e-4, rtol=1e-4), "mu mismatch"
        assert jnp.allclose(sig, sig_r, atol=1e-4, rtol=1e-4), "sig mismatch"
        assert jnp.allclose(z, z_r, atol=1e-4, rtol=1e-4), "Z mismatch"
        assert jnp.allclose(y, y_r, atol=1e-4, rtol=1e-4), "Y mismatch"

    k1, k2 = jax.random.split(k_data)
    check(BATCH, k1)   # small demo batch (single 128-lane tile)
    check(384, k2)     # exercises batch padding + even 2-step parallel grid

    # TODO(synk): training loop / VAE KL loss / optimizer from the PyTorch
    # module are host-side logic and not part of the forward kernel.
    print("KERNEL_OK")
</pallas_src>

<mosaic_0001>
module attributes {stable_mosaic.version = 11 : i64} {
  func.func @scinet_kernel(%arg0: i32, %arg1: memref<32x128xf32, #tpu.memory_space<vmem>>, %arg2: memref<192x32xf32, #tpu.memory_space<vmem>>, %arg3: memref<192x1xf32, #tpu.memory_space<vmem>>, %arg4: memref<40x128xf32, #tpu.memory_space<vmem>>) attributes {dimension_semantics = [#tpu.dimension_semantics<parallel>], iteration_bounds = array<i64: 1>, scalar_prefetch = 0 : i64, scratch_operands = 0 : i64, tpu.core_type = #tpu.core_type<tc>, window_params = [{transform_indices = @transform_0, window_bounds = array<i64: 32, 128>}, {pipeline_mode = #tpu.pipeline_mode<synchronous>, transform_indices = @transform_1, window_bounds = array<i64: 192, 32>}, {pipeline_mode = #tpu.pipeline_mode<synchronous>, transform_indices = @transform_2, window_bounds = array<i64: 192, 1>}, {transform_indices = @transform_3, window_bounds = array<i64: 40, 128>}]} {
    %c0 = arith.constant 0 : index
    %c0_0 = arith.constant 0 : index
    %0 = vector.load %arg1[%c0, %c0_0] : memref<32x128xf32, #tpu.memory_space<vmem>>, vector<32x128xf32>
    %c0_1 = arith.constant 0 : index
    %c0_2 = arith.constant 0 : index
    %1 = vector.load %arg2[%c0_1, %c0_2] : memref<192x32xf32, #tpu.memory_space<vmem>>, vector<64x32xf32>
    %cst = arith.constant dense<0.000000e+00> : vector<64x128xf32>
    %2 = tpu.matmul %1, %0, %cst {dimension_numbers = #tpu.dot_dimension_numbers<[1], [0], [0], [1], [0, 0, 1, 1], [], []>} : vector<64x32xf32>, vector<32x128xf32>, vector<64x128xf32> -> vector<64x128xf32>
    %c0_3 = arith.constant 0 : index
    %c0_4 = arith.constant 0 : index
    %3 = vector.load %arg3[%c0_3, %c0_4] : memref<192x1xf32, #tpu.memory_space<vmem>>, vector<64x1xf32>
    %4 = vector.broadcast %3 : vector<64x1xf32> to vector<64x128xf32>
    %5 = arith.addf %2, %4 : vector<64x128xf32>
    %6 = vector.extract_strided_slice %5 {offsets = [0, 0], sizes = [32, 128], strides = [1, 1]} : vector<64x128xf32> to vector<32x128xf32>
    %cst_5 = arith.constant 0.000000e+00 : f32
    %7 = vector.broadcast %cst_5 : f32 to vector<32x128xf32>
    %8 = arith.maximumf %6, %7 : vector<32x128xf32>
    %9 = vector.extract_strided_slice %5 {offsets = [32, 0], sizes = [32, 128], strides = [1, 1]} : vector<64x128xf32> to vector<32x128xf32>
    %c64 = arith.constant 64 : index
    %c0_6 = arith.constant 0 : index
    %10 = vector.load %arg2[%c64, %c0_6] : memref<192x32xf32, #tpu.memory_space<vmem>>, vector<32x32xf32>
    %cst_7 = arith.constant dense<0.000000e+00> : vector<32x128xf32>
    %11 = tpu.matmul %10, %8, %cst_7 {dimension_numbers = #tpu.dot_dimension_numbers<[1], [0], [0], [1], [0, 0, 1, 1], [], []>} : vector<32x32xf32>, vector<32x128xf32>, vector<32x128xf32> -> vector<32x128xf32>
    %c64_8 = arith.constant 64 : index
    %c0_9 = arith.constant 0 : index
    %12 = vector.load %arg3[%c64_8, %c0_9] : memref<192x1xf32, #tpu.memory_space<vmem>>, vector<32x1xf32>
    %13 = vector.broadcast %12 : vector<32x1xf32> to vector<32x128xf32>
    %14 = arith.addf %11, %13 : vector<32x128xf32>
    %cst_10 = arith.constant 0.000000e+00 : f32
    %15 = vector.broadcast %cst_10 : f32 to vector<32x128xf32>
    %16 = arith.maximumf %14, %15 : vector<32x128xf32>
    %c96 = arith.constant 96 : index
    %c0_11 = arith.constant 0 : index
    %17 = vector.load %arg2[%c96, %c0_11] : memref<192x32xf32, #tpu.memory_space<vmem>>, vector<32x32xf32>
    %cst_12 = arith.constant dense<0.000000e+00> : vector<32x128xf32>
    %18 = tpu.matmul %17, %16, %cst_12 {dimension_numbers = #tpu.dot_dimension_numbers<[1], [0], [0], [1], [0, 0, 1, 1], [], []>} : vector<32x32xf32>, vector<32x128xf32>, vector<32x128xf32> -> vector<32x128xf32>
    %c96_13 = arith.constant 96 : index
    %c0_14 = arith.constant 0 : index
    %19 = vector.load %arg3[%c96_13, %c0_14] : memref<192x1xf32, #tpu.memory_space<vmem>>, vector<32x1xf32>
    %20 = vector.broadcast %19 : vector<32x1xf32> to vector<32x128xf32>
    %21 = arith.addf %18, %20 : vector<32x128xf32>
    %22 = vector.extract_strided_slice %21 {offsets = [0, 0], sizes = [8, 128], strides = [1, 1]} : vector<32x128xf32> to vector<8x128xf32>
    %23 = vector.extract_strided_slice %21 {offsets = [8, 0], sizes = [8, 128], strides = [1, 1]} : vector<32x128xf32> to vector<8x128xf32>
    %cst_15 = arith.constant 5.000000e-01 : f32
    %24 = vector.broadcast %cst_15 : f32 to vector<8x128xf32>
    %25 = arith.mulf %24, %23 : vector<8x128xf32>
    %26 = vector.extract_strided_slice %0 {offsets = [24, 0], sizes = [8, 128], strides = [1, 1]} : vector<32x128xf32> to vector<8x128xf32>
    %27 = math.exp %25 : vector<8x128xf32>
    %28 = arith.mulf %26, %27 : vector<8x128xf32>
    %29 = arith.addf %22, %28 : vector<8x128xf32>
    %cst_16 = arith.constant 0.000000e+00 : f32
    %30 = vector.broadcast %cst_16 : f32 to vector<24x128xf32>
    %31 = tpu.concatenate %29, %30 in 0 : vector<8x128xf32>, vector<24x128xf32> -> vector<32x128xf32>
    %c128 = arith.constant 128 : index
    %c0_17 = arith.constant 0 : index
    %32 = vector.load %arg2[%c128, %c0_17] : memref<192x32xf32, #tpu.memory_space<vmem>>, vector<32x32xf32>
    %cst_18 = arith.constant dense<0.000000e+00> : vector<32x128xf32>
    %33 = tpu.matmul %32, %31, %cst_18 {dimension_numbers = #tpu.dot_dimension_numbers<[1], [0], [0], [1], [0, 0, 1, 1], [], []>} : vector<32x32xf32>, vector<32x128xf32>, vector<32x128xf32> -> vector<32x128xf32>
    %34 = arith.addf %9, %33 : vector<32x128xf32>
    %cst_19 = arith.constant 0.000000e+00 : f32
    %35 = vector.broadcast %cst_19 : f32 to vector<32x128xf32>
    %36 = arith.maximumf %34, %35 : vector<32x128xf32>
    %c160 = arith.constant 160 : index
    %c0_20 = arith.constant 0 : index
    %37 = vector.load %arg2[%c160, %c0_20] : memref<192x32xf32, #tpu.memory_space<vmem>>, vector<32x32xf32>
    %cst_21 = arith.constant dense<0.000000e+00> : vector<32x128xf32>
    %38 = tpu.matmul %37, %36, %cst_21 {dimension_numbers = #tpu.dot_dimension_numbers<[1], [0], [0], [1], [0, 0, 1, 1], [], []>} : vector<32x32xf32>, vector<32x128xf32>, vector<32x128xf32> -> vector<32x128xf32>
    %c160_22 = arith.constant 160 : index
    %c0_23 = arith.constant 0 : index
    %39 = vector.load %arg3[%c160_22, %c0_23] : memref<192x1xf32, #tpu.memory_space<vmem>>, vector<32x1xf32>
    %40 = vector.broadcast %39 : vector<32x1xf32> to vector<32x128xf32>
    %41 = arith.addf %38, %40 : vector<32x128xf32>
    %c0_24 = arith.constant 0 : index
    %c0_25 = arith.constant 0 : index
    %42 = vector.load %arg4[%c0_24, %c0_25] : memref<40x128xf32, #tpu.memory_space<vmem>>, vector<8x128xf32>
    tpu.vector_store %arg4[%c0_24, %c0_25], %22 {strides = array<i32>} : memref<40x128xf32, #tpu.memory_space<vmem>>, vector<8x128xf32>,
    %c8 = arith.constant 8 : index
    %c0_26 = arith.constant 0 : index
    %43 = vector.load %arg4[%c8, %c0_26] : memref<40x128xf32, #tpu.memory_space<vmem>>, vector<8x128xf32>
    tpu.vector_store %arg4[%c8, %c0_26], %25 {strides = array<i32>} : memref<40x128xf32, #tpu.memory_space<vmem>>, vector<8x128xf32>,
    %c16 = arith.constant 16 : index
    %c0_27 = arith.constant 0 : index
    %44 = vector.load %arg4[%c16, %c0_27] : memref<40x128xf32, #tpu.memory_space<vmem>>, vector<8x128xf32>
    tpu.vector_store %arg4[%c16, %c0_27], %29 {strides = array<i32>} : memref<40x128xf32, #tpu.memory_space<vmem>>, vector<8x128xf32>,
    %45 = vector.extract_strided_slice %41 {offsets = [0, 0], sizes = [16, 128], strides = [1, 1]} : vector<32x128xf32> to vector<16x128xf32>
    %c24 = arith.constant 24 : index
    %c0_28 = arith.constant 0 : index
    %46 = vector.load %arg4[%c24, %c0_28] : memref<40x128xf32, #tpu.memory_space<vmem>>, vector<16x128xf32>
    tpu.vector_store %arg4[%c24, %c0_28], %45 {strides = array<i32>} : memref<40x128xf32, #tpu.memory_space<vmem>>, vector<16x128xf32>,
    return
  }
  func.func @transform_0(%arg0: i32) -> (i32, i32) {
    %c0_i32 = arith.constant 0 : i32
    %c0_i32_0 = arith.constant 0 : i32
    return %c0_i32, %arg0 : i32, i32
  }
  func.func @transform_1(%arg0: i32) -> (i32, i32) {
    %c0_i32 = arith.constant 0 : i32
    %c0_i32_0 = arith.constant 0 : i32
    %c0_i32_1 = arith.constant 0 : i32
    return %c0_i32, %c0_i32_0 : i32, i32
  }
  func.func @transform_2(%arg0: i32) -> (i32, i32) {
    %c0_i32 = arith.constant 0 : i32
    %c0_i32_0 = arith.constant 0 : i32
    %c0_i32_1 = arith.constant 0 : i32
    return %c0_i32, %c0_i32_0 : i32, i32
  }
  func.func @transform_3(%arg0: i32) -> (i32, i32) {
    %c0_i32 = arith.constant 0 : i32
    %c0_i32_0 = arith.constant 0 : i32
    return %c0_i32, %arg0 : i32, i32
  }
}

</mosaic_0001>

<bundles_post_ra>
// kernel: tpu_custom_call.1
= control target key start
LH: loop header
LB: loop body
LE: loop exit
PB: predicated region body
PF: predicated region fallthrough
CT: control target
= control target key end

     0   :  { %vm75_vm0 = vcmask 261120   ;;  %v922_v6 = vmov 0   ;;  %s1118_s0 = inlined_call_operand.vmem [shape: f32[32,128], index: 0, kind: input, shape index: {}]   ;;  %s1119_s1 = inlined_call_operand.vmem [shape: f32[192,32], index: 1, kind: input, shape index: {}]   ;;  %s1120_s2 = inlined_call_operand.vmem [shape: f32[192,1], index: 2, kind: input, shape index: {}]   ;;  %s1121_s3 = inlined_call_operand.hbm [shape: f32[40,128], index: 3, kind: output, shape index: {}]  }
   0x1   :  { %v15_v0 = vld [vmem:[%s1118_s0] sm:$0xff]  ;;  %v16_v1 = vld [vmem:[%s1118_s0 + $0x8] sm:$0xff]  ;;  %v17_v2 = vld [vmem:[%s1118_s0 + $0x10] sm:$0xff]  ;;  %894 = vset.pattern.permute.xlu0 %v922_v6  ;;  %895 = vset.pattern.permute.xlu1 %v922_v6 }
   0x2   :  { %v850_v3 = vpack.c.bf16 %v16_v1, %v15_v0  ;;  %v958_v4 = vld [vmem:[%s1118_s0 + $0x18] sm:$0xff]  ;;  %v19_v5 = vld [vmem:[%s1119_s1] sm:$0xff]  ;;  %v29_v9 = vld [vmem:[%s1120_s2 + $0x10] sm:$0xff] }
   0x3   :  { %v854_v7 = vpack.c.bf16 %v958_v4, %v17_v2  ;;  %788 = vmatprep.mubr.msk.f32.mxu0 %vm75_vm0, %v19_v5  ;;  %v27_v8 = vld [vmem:[%s1120_s2] sm:$0xff]  ;;  %47 = vperm.xlu1 %895, %v29_v9   ;;  %v28_v10 = vld [vmem:[%s1120_s2 + $0x8] sm:$0xff]  ;;  %v30_v11 = vld [vmem:[%s1120_s2 + $0x18] sm:$0xff] }
   0x4   :  { %851 = vmatprep.subr.bf16.mxu0 %v850_v3  ;;  %37 = vperm.xlu0 %894, %v27_v8   ;;  %v20_v12 = vld [vmem:[%s1119_s1 + $0x8] sm:$0xff]  ;;  %v213_v13 = vld [vmem:[%s1120_s2 + $0x40] sm:$0xff] }
   0x5   :  { %853 = vmatpush3.bf16.msra.mxu0 %v850_v3 }
   0x6   :  { %855 = vmatprep.subr.bf16.mxu0 %v854_v7 }
   0x7   :  { %52 = vperm.xlu1 %895, %v30_v11  }
   0x8   :  { %42 = vperm.xlu0 %894, %v28_v10  }
   0x9   :  { %857 = vmatpush3.bf16.msra.mxu0 %v854_v7 }
   0xa   :  { %8 = vsyncpa [#allocation3], 0  ;;  %v21_v14 = vld [vmem:[%s1119_s1 + $0x10] sm:$0xff]  ;;  %v214_v15 = vld [vmem:[%s1120_s2 + $0x48] sm:$0xff]  ;;  %s923_s14 = smov [#allocation2]  }
   0xb   :  { %v22_v16 = vld [vmem:[%s1119_s1 + $0x18] sm:$0xff]  ;;  %224 = vperm.xlu1 %895, %v214_v15   ;;  %v215_v17 = vld [vmem:[%s1120_s2 + $0x50] sm:$0xff]  ;;  %v343_v19 = vld [vmem:[%s1120_s2 + $0x68] sm:$0xff]  ;;  %s704_s15 = sshll.u32 %s923_s14, 4  ;;  %s705_s15 = int_to_ptr.vmem [resolvable:$true] %s704_s15 }
   0xc   :  { %789 = vmatmul.mubr.msk.f32.vlgmr.msra.gmra.mrb[0].mxu0 %vm75_vm0, %v20_v12  ;;  %219 = vperm.xlu0 %894, %v213_v13   ;;  %v216_v18 = vld [vmem:[%s1120_s2 + $0x58] sm:$0xff]  ;;  %v342_v20 = vld [vmem:[%s1120_s2 + $0x60] sm:$0xff]  ;;  %v32_v22 = vld [vmem:[%s1120_s2 + $0x28] sm:$0xff]  ;;  %s898_s16 = scalar_lea.vmem %s705_s15, 640  ;;  %p903_p1 = scmp.lt.s32.totalorder %s705_s15, %s705_s15 }
   0xd   :  { %791 = vmatprep.mubr.msk.f32.mxu0 %vm75_vm0, %v21_v14  ;;  %v31_v21 = vld [vmem:[%s1120_s2 + $0x20] sm:$0xff]  ;;  %v33_v23 = vld [vmem:[%s1120_s2 + $0x30] sm:$0xff]  ;;  %v34_v24 = vld [vmem:[%s1120_s2 + $0x38] sm:$0xff]  ;;  %p899_p0 = scmp.ne.s32.totalorder %s705_s15, %s898_s16  ;;  %p904_p2 = scmp.lt.s32.totalorder %s898_s16, %s898_s16 }
   0xe   :  { %v577_v25 = vld [vmem:[%s1120_s2 + $0xa0] sm:$0xff]  ;;  %v578_v26 = vld [vmem:[%s1120_s2 + $0xa8] sm:$0xff]  ;;  %v211_v47 = vld [vmem:[%s1119_s1 + $0x50] sm:$0xff] }
   0xf   :  { %234 = vperm.xlu1 %895, %v216_v18   ;;  %v209_v27 = vld [vmem:[%s1119_s1 + $0x40] sm:$0xff]  ;;  %v210_v46 = vld [vmem:[%s1119_s1 + $0x48] sm:$0xff]  ;;  %v212_v48 = vld [vmem:[%s1119_s1 + $0x58] sm:$0xff]  ;;  %p905_p3 = por %p904_p2, %p903_p1 }
  0x10   :  { %792 = vmatmul.mubr.msk.f32.gmra.mrb[2].mxu0 %vm75_vm0, %v22_v16  ;;  %229 = vperm.xlu0 %894, %v215_v17   ;;  %v338_v49 = vld [vmem:[%s1119_s1 + $0x60] sm:$0xff]  ;;  %v339_v5 = vld [vmem:[%s1119_s1 + $0x68] sm:$0xff]  ;;  %v25_v8 = vld [vmem:[%s1119_s1 + $0x30] sm:$0xff] }
  0x11   :  { %808 = vmatprep.mubr.msk.f32.mxu1 %vm75_vm0, %v209_v27  ;;  %v23_v6 = vld [vmem:[%s1119_s1 + $0x20] sm:$0xff]  ;;  %v24_v7 = vld [vmem:[%s1119_s1 + $0x28] sm:$0xff]  ;;  %v26_v9 = vld [vmem:[%s1119_s1 + $0x38] sm:$0xff]  ;;  %p906_p4 = pnand %p905_p3, %p899_p0 }
  0x12   :  { %794 = vmatprep.mubr.msk.f32.mxu0 %vm75_vm0, %v23_v6  ;;  %v464_v10 = vld [vmem:[%s1119_s1 + $0x80] sm:$0xff] }
  0x13   :  { %348 = vperm.xlu1 %895, %v342_v20  }
  0x14   :  { %353 = vperm.xlu0 %894, %v343_v19   ;;  %795 = vmatmul.mubr.msk.f32.gmra.mrb[4].mxu0 %vm75_vm0, %v24_v7 }
  0x15   :  { %797 = vmatprep.mubr.msk.f32.mxu0 %vm75_vm0, %v25_v8 }
  0x17   :  { %62 = vperm.xlu1 %895, %v32_v22   ;;  %v465_v22 = vld [vmem:[%s1119_s1 + $0x88] sm:$0xff] }
  0x18   :  { %57 = vperm.xlu0 %894, %v31_v21   ;;  %798 = vmatmul.mubr.msk.f32.gmra.mrb[6].mxu0 %vm75_vm0, %v26_v9 }
  0x19   :  { %830 = vmatprep.mubr.msk.f32.mxu0 %vm75_vm0, %v464_v10 }
  0x1b   :  { %72 = vperm.xlu1 %895, %v34_v24   ;;  %v340_v24 = vld [vmem:[%s1119_s1 + $0x70] sm:$0xff] }
  0x1c   :  { %67 = vperm.xlu0 %894, %v33_v23   ;;  %v466_v23 = vld [vmem:[%s1119_s1 + $0x90] sm:$0xff] }
  0x1f   :  { %588 = vperm.xlu1 %895, %v578_v26   ;;  %v573_v26 = vld [vmem:[%s1119_s1 + $0xa0] sm:$0xff] }
  0x20   :  { %583 = vperm.xlu0 %894, %v577_v25   ;;  %v341_v25 = vld [vmem:[%s1119_s1 + $0x78] sm:$0xff] }
  0x82   :  { %v48_v29 = vpop.permute.xlu1 %47 }
  0x83   :  { %v38_v28 = vpop.permute.xlu0 %37 }
  0x86   :  { %v53_v36 = vpop.permute.xlu1 %52 }
  0x87   :  { %v43_v30 = vpop.permute.xlu0 %42 }
  0x8a   :  { %v225_v50 = vpop.permute.xlu1 %224 }
  0x8b   :  { %v220_v51 = vpop.permute.xlu0 %219 }
  0x8e   :  { %v235_v57 = vpop.permute.xlu1 %234 }
  0x8f   :  { %v230_v60 = vpop.permute.xlu0 %229 }
  0x92   :  { %v349_v13 = vpop.permute.xlu1 %348 }
  0x93   :  { %v354_v11 = vpop.permute.xlu0 %353 }
  0x96   :  { %v63_v27 = vpop.permute.xlu1 %62 }
  0xdf   :  { %v790_v31 = vpop.f32.mrb[0].mxu0 }
  0xe0   :  { %v172_v32 = vadd.f32 %v790_v31, %v43_v30  ;;  %v166_v33 = vpop.f32.mrb[1].mxu0 }
  0xe1   :  { %v167_v34 = vadd.f32 %v166_v33, %v38_v28  ;;  %v58_v28 = vpop.permute.xlu0 %57 }
  0xe2   :  { %v206_v35 = vmax.f32 %v172_v32, 0.0 }
  0xe3   :  { %v205_v37 = vmax.f32 %v167_v34, 0.0  ;;  %v793_v38 = vpop.f32.mrb[2].mxu0  ;;  %v73_v34 = vpop.permute.xlu1 %72 }
  0xe4   :  { %v182_v39 = vadd.f32 %v793_v38, %v53_v36  ;;  %v176_v40 = vpop.f32.mrb[3].mxu0 }
  0xe5   :  { %v177_v41 = vadd.f32 %v176_v40, %v48_v29  ;;  %v858_v42 = vpack.c.bf16 %v206_v35, %v205_v37  ;;  %v68_v37 = vpop.permute.xlu0 %67 }
  0xe6   :  { %v208_v43 = vmax.f32 %v182_v39, 0.0 }
  0xe7   :  { %v207_v44 = vmax.f32 %v177_v41, 0.0  ;;  %859 = vmatprep.subr.bf16.mxu1 %v858_v42 }
  0xe8   :  { %861 = vmatpush3.bf16.msra.mxu1 %v858_v42 }
  0xe9   :  { %v862_v45 = vpack.c.bf16 %v208_v43, %v207_v44 }
  0xeb   :  { %863 = vmatprep.subr.bf16.mxu1 %v862_v45 }
  0xec   :  { %865 = vmatpush3.bf16.msra.mxu1 %v862_v45  ;;  %v574_v45 = vld [vmem:[%s1119_s1 + $0xa8] sm:$0xff] }
  0xef   :  { %809 = vmatmul.mubr.msk.f32.vlgmr.msra.gmra.mrb[0].mxu1 %vm75_vm0, %v210_v46  ;;  %v575_v46 = vld [vmem:[%s1119_s1 + $0xb0] sm:$0xff] }
  0xf0   :  { %811 = vmatprep.mubr.msk.f32.mxu1 %vm75_vm0, %v211_v47  ;;  %v576_v47 = vld [vmem:[%s1119_s1 + $0xb8] sm:$0xff] }
  0xf3   :  { %812 = vmatmul.mubr.msk.f32.gmra.mrb[2].mxu1 %vm75_vm0, %v212_v48 }
  0xf4   :  { %822 = vmatprep.mubr.msk.f32.mxu1 %vm75_vm0, %v338_v49 }
 0x1c2   :  { %v810_v52 = vpop.f32.mrb[0].mxu1 }
 0x1c3   :  { %v321_v53 = vadd.f32 %v810_v52, %v225_v50  ;;  %v315_v54 = vpop.f32.mrb[1].mxu1  ;;  %v589_v50 = vpop.permute.xlu1 %588 }
 0x1c4   :  { %v316_v55 = vadd.f32 %v315_v54, %v220_v51  ;;  %v584_v52 = vpop.permute.xlu0 %583 }
 0x1c5   :  { %v335_v56 = vmax.f32 %v321_v53, 0.0 }
 0x1c6   :  { %v334_v58 = vmax.f32 %v316_v55, 0.0  ;;  %v813_v59 = vpop.f32.mrb[2].mxu1 }
 0x1c7   :  { %v331_v61 = vadd.f32 %v813_v59, %v235_v57  ;;  %v325_v62 = vpop.f32.mrb[3].mxu1 }
 0x1c8   :  { %v866_v63 = vpack.c.bf16 %v335_v56, %v334_v58  ;;  %v326_v0 = vadd.f32 %v325_v62, %v230_v60 }
 0x1c9   :  { %v337_v1 = vmax.f32 %v331_v61, 0.0 }
 0x1ca   :  { %v336_v2 = vmax.f32 %v326_v0, 0.0  ;;  %867 = vmatprep.subr.bf16.mxu1 %v866_v63 }
 0x1cb   :  { %869 = vmatpush3.bf16.msra.mxu1 %v866_v63 }
 0x1cc   :  { %v870_v3 = vpack.c.bf16 %v337_v1, %v336_v2 }
 0x1ce   :  { %871 = vmatprep.subr.bf16.mxu1 %v870_v3 }
 0x1cf   :  { %873 = vmatpush3.bf16.msra.mxu1 %v870_v3 }
 0x1d2   :  { %823 = vmatmul.mubr.msk.f32.vlgmr.msra.gmra.mrb[4].mxu1 %vm75_vm0, %v339_v5 }
 0x1d3   :  { %825 = vmatprep.mubr.msk.f32.mxu1 %vm75_vm0, %v340_v24 }
 0x1d6   :  { %826 = vmatmul.mubr.msk.f32.gmra.mrb[6].mxu1 %vm75_vm0, %v341_v25 }
 0x1d7   :  { %844 = vmatprep.mubr.msk.f32.mxu1 %vm75_vm0, %v573_v26 }
 0x2a5   :  { %v824_v12 = vpop.f32.mrb[4].mxu1 }
 0x2a6   :  { %v448_v14 = vadd.f32 %v824_v12, %v354_v11  ;;  %v442_v15 = vpop.f32.mrb[5].mxu1 }
 0x2a7   :  { %v443_v16 = vadd.f32 %v442_v15, %v349_v13 }
 0x2a8   :  { %v459_v17 = vmul.f32 0.5, %v448_v14 }
 0x2a9   :  { %694 = vst [vmem:[#allocation2] sm:$0xff] %v443_v16  ;;  %v827_v48 = vpop.f32.mrb[6].mxu1 }
 0x2aa   :  { %v460_v18 = vmul.f32 1.442695, %v459_v17  ;;  %695 = vst [vmem:[#allocation2 + $0x8] sm:$0xff] %v459_v17  ;;  %v452_v49 = vpop.f32.mrb[7].mxu1 }
 0x2ac   :  { %896 = vpow2.f32 %v460_v18 }
 0x2b6   :  { %v897_v19 = vpop.eup %896 }
 0x2b7   :  { %v462_v20 = vmul.f32 %v897_v19, %v958_v4  ;;  %v467_v4 = vld [vmem:[%s1119_s1 + $0x98] sm:$0xff] }
 0x2b9   :  { %v463_v21 = vadd.f32 %v462_v20, %v443_v16 }
 0x2bb   :  { %696 = vst [vmem:[#allocation2 + $0x10] sm:$0xff] %v463_v21  ;;  %828 = vmatprep.subr.mxu0 %v463_v21 }
 0x2bc   :  { %829 = vmatpush3.msra.mxu0 %v463_v21 }
 0x2bd   :  { %831 = vmatmul.mubr.msk.f32.vlgmr.msra.gmra.mrb[4].mxu0 %vm75_vm0, %v465_v22 }
 0x2be   :  { %833 = vmatprep.mubr.msk.f32.mxu0 %vm75_vm0, %v466_v23 }
 0x2c1   :  { %834 = vmatmul.mubr.msk.f32.gmra.mrb[6].mxu0 %vm75_vm0, %v467_v4 }
 0x390   :  { %v832_v29 = vpop.f32.mrb[4].mxu0 }
 0x391   :  { %v882_v30 = vadd.f32 %v832_v29, %v63_v27  ;;  %v546_v31 = vpop.f32.mrb[5].mxu0 }
 0x392   :  { %v883_v32 = vadd.f32 %v546_v31, %v58_v28 }
 0x393   :  { %v570_v33 = vmax.f32 %v882_v30, 0.0 }
 0x394   :  { %v569_v35 = vmax.f32 %v883_v32, 0.0  ;;  %v835_v36 = vpop.f32.mrb[6].mxu0 }
 0x395   :  { %v884_v38 = vadd.f32 %v835_v36, %v73_v34  ;;  %v556_v39 = vpop.f32.mrb[7].mxu0 }
 0x396   :  { %v874_v40 = vpack.c.bf16 %v570_v33, %v569_v35  ;;  %v885_v41 = vadd.f32 %v556_v39, %v68_v37 }
 0x397   :  { %v572_v42 = vmax.f32 %v884_v38, 0.0 }
 0x398   :  { %v571_v43 = vmax.f32 %v885_v41, 0.0  ;;  %875 = vmatprep.subr.bf16.mxu1 %v874_v40 }
 0x399   :  { %877 = vmatpush3.bf16.msra.mxu1 %v874_v40 }
 0x39a   :  { %v878_v44 = vpack.c.bf16 %v572_v42, %v571_v43 }
 0x39c   :  { %879 = vmatprep.subr.bf16.mxu1 %v878_v44 }
 0x39d   :  { %881 = vmatpush3.bf16.msra.mxu1 %v878_v44 }
 0x3a0   :  { %845 = vmatmul.mubr.msk.f32.vlgmr.msra.gmra.mrb[8].mxu1 %vm75_vm0, %v574_v45 }
 0x3a1   :  { %847 = vmatprep.mubr.msk.f32.mxu1 %vm75_vm0, %v575_v46 }
 0x3a4   :  { %848 = vmatmul.mubr.msk.f32.gmra.mrb[10].mxu1 %vm75_vm0, %v576_v47 }
 0x473   :  { %v846_v51 = vpop.f32.mrb[8].mxu1 }
 0x474   :  { %v683_v53 = vadd.f32 %v846_v51, %v589_v50  ;;  %v677_v54 = vpop.f32.mrb[9].mxu1 }
 0x475   :  { %v678_v55 = vadd.f32 %v677_v54, %v584_v52 }
 0x476   :  { %698 = vst [vmem:[#allocation2 + $0x20] sm:$0xff] %v683_v53 }
 0x477   :  { %697 = vst [vmem:[#allocation2 + $0x18] sm:$0xff] %v678_v55  ;;  %v849_v56 = vpop.f32.mrb[10].mxu1 }
 0x478   :  { %v687_v57 = vpop.f32.mrb[11].mxu1 }
 0x479   :  { %909 = shalt.err (!%p906_p4)
}
 0x47a   :  { %s910_s18 = scalar_lea.hbm %s1121_s3, 640 }
 0x47b   :  { %p911_p5 = scmp.ne.s32.totalorder %s1121_s3, %s910_s18  ;;  %p914_p6 = scmp.lt.u32.totalorder %s910_s18, %s1121_s3 }
 0x47d   :  { %p916_p7 = pnand %p914_p6, %p911_p5 }
 0x47f   :  { %919 = shalt.err (!%p916_p7)
}
 0x480   :  { %s924_s23 = smov 128   ;;  %s925_s24 = smov 8  }
 0x481   :  { %710 = dma.vmem_to_hbm [thread:$0]  %s705_s15, 640, %s1121_s3, [#allocation3], %s924_s23, %s924_s23, %s925_s24  }
 0x482   :  { %920 = dma.done.wait [#allocation3], 640  }
 0x483   :  { %921 = vsyncadd [#allocation3], 4294966656 }
 0x484   :  { %714 = vsyncpa [#allocation3], 1 }

</bundles_post_ra>
